<compile_context>
chip_gen: v6e
topology: v6e:2x2x1
jax: 0.10.0
libtpu: 0.0.40
codegen_flags: <defaults>
</compile_context>

<pallas_src>
import functools

import jax
import jax.numpy as jnp
from jax.experimental import pallas as pl
from jax.experimental.pallas import tpu as pltpu

FEAT = 6          # raw feature count of the module (Linear(6, 128))
FEAT_PAD = 8      # 6 features + must_1_flag + ones row -> 8 sublanes
HIDDEN = 128
NCLASS = 2
OUT_PAD = 8       # W3/b3 padded to 8 output rows (full vreg sublanes)


def _decoder_kernel(x_ref, w1_ref, w2_ref, b2_ref, w3_ref, b3_ref, out_ref, *,
                    logit_clipping):
    # x_ref: (8, T) bf16 -- rows 0..5 features, row 6 = flag, row 7 = 1.0
    xb = x_ref[...]
    flag = xb[FEAT:FEAT + 1, :].astype(jnp.float32)          # (1, T), 0.0/1.0

    # layer 1 (+ folded b1): (128, 8) @ (8, T) -> (128, T)
    #   W1^T column 6 is zero (flag row contributes nothing),
    #   column 7 holds b1 and multiplies the ones row.
    h1 = jnp.dot(w1_ref[...], xb, preferred_element_type=jnp.float32)
    h1 = jnp.maximum(h1, 0.0)

    # layer 2: (128, 128) @ (128, T) -> (128, T)   (dominant FLOPs, bf16 MXU)
    h2 = jnp.dot(w2_ref[...], h1.astype(jnp.bfloat16),
                 preferred_element_type=jnp.float32) + b2_ref[...]
    h2 = jnp.maximum(h2, 0.0)

    # layer 3: (8, 128) @ (128, T) -> (8, T); rows 2..7 are zero padding.
    s = jnp.dot(w3_ref[...], h2.astype(jnp.bfloat16),
                preferred_element_type=jnp.float32) + b3_ref[...]
    t = logit_clipping * jnp.tanh(s[0:NCLASS, :])            # (2, T), f32

    # masked 2-way softmax == sigmoid of the clipped logit difference;
    # the flag select gives exact p1 = 1.0 / p0 = 0.0 on flagged rows.
    d = t[1:2, :] - t[0:1, :]                                # (1, T)
    p1 = pl.reciprocal(1.0 + jnp.exp(-d), approx=True)       # EUP recip
    p1 = jnp.where(flag > 0.5, 1.0, p1)
    out_ref[0:1, :] = 1.0 - p1
    out_ref[1:2, :] = p1


def make_params(key):
    """Deterministic synthetic params matching nn.Linear(6,128)/(128,128)/(128,2).

    Stored in the y = x @ W + b orientation (like the f32 reference uses).
    """
    k1, k2, k3, k4, k5, k6 = jax.random.split(key, 6)
    w1 = jax.random.normal(k1, (FEAT, HIDDEN), jnp.float32) * 0.1
    b1 = jax.random.normal(k2, (HIDDEN,), jnp.float32) * 0.1
    w2 = jax.random.normal(k3, (HIDDEN, HIDDEN), jnp.float32) * 0.05
    b2 = jax.random.normal(k4, (HIDDEN,), jnp.float32) * 0.1
    w3 = jax.random.normal(k5, (HIDDEN, NCLASS), jnp.float32) * 0.1
    b3 = jax.random.normal(k6, (NCLASS,), jnp.float32) * 0.1
    return w1, b1, w2, b2, w3, b3


def _round_up(x, m):
    return ((x + m - 1) // m) * m


def _choose_tile(n, max_tile=4096):
    """Lane-aligned row tile <= max_tile giving an even (>=2) grid length."""
    if n <= 128:
        return 128
    pairs = max(1, pl.cdiv(n, 2 * max_tile))        # grid length ~= 2 * pairs
    return max(128, min(max_tile, _round_up(pl.cdiv(n, 2 * pairs), 128)))


def binary_decoder(input_cat, must_1_flag, params, *, logit_clipping=10.0,
                   tile_n=None, channel_major_output=False):
    w1, b1, w2, b2, w3, b3 = params
    B, P, S, F = input_cat.shape
    assert F == FEAT
    N = B * P * S
    tile = int(tile_n) if tile_n is not None else _choose_tile(N)
    assert tile % 128 == 0, "tile must be lane-aligned (multiple of 128)"

    # --- lane-major packed bf16 input: [8, N] (features, flag, ones) ---------
    xT = input_cat.reshape(N, FEAT).astype(jnp.bfloat16).T          # (6, N)
    flag = must_1_flag.reshape(1, N).astype(jnp.bfloat16)           # (1, N)
    ones = jnp.ones((1, N), jnp.bfloat16)                           # (1, N)
    x_packed = jnp.concatenate([xT, flag, ones], axis=0)            # (8, N) bf16

    # --- weights: pre-transposed bf16 MXU operands (built once) --------------
    # W1^T: column 6 = 0 (flag row), column 7 = b1 (rides the ones row).
    w1t = jnp.concatenate(
        [w1.T, jnp.zeros((HIDDEN, 1), jnp.float32),
         b1.reshape(HIDDEN, 1)], axis=1).astype(jnp.bfloat16)       # (128, 8)
    w2t = w2.T.astype(jnp.bfloat16)                                  # (128, 128)
    b2c = b2.reshape(HIDDEN, 1).astype(jnp.float32)                  # (128, 1)
    # W3^T / b3 padded to 8 output rows (full sublane tiles).
    w3p = jnp.concatenate(
        [w3.T, jnp.zeros((OUT_PAD - NCLASS, HIDDEN), jnp.float32)],
        axis=0).astype(jnp.bfloat16)                                 # (8, 128)
    b3p = jnp.concatenate(
        [b3, jnp.zeros((OUT_PAD - NCLASS,), jnp.float32)]
    ).reshape(OUT_PAD, 1).astype(jnp.float32)                        # (8, 1)

    # no explicit pad of N: Pallas masks the partial last block (no cross-row
    # reduction, so out-of-range lanes never affect valid outputs)
    grid = (pl.cdiv(N, tile),)
    kernel = functools.partial(_decoder_kernel,
                               logit_clipping=float(logit_clipping))

    cost = pl.CostEstimate(
        flops=2 * N * (FEAT_PAD * HIDDEN + HIDDEN * HIDDEN + HIDDEN * OUT_PAD),
        transcendentals=4 * N,
        bytes_accessed=(FEAT_PAD * N * 2 + NCLASS * N * 4
                        + (HIDDEN * FEAT_PAD + HIDDEN * HIDDEN
                           + OUT_PAD * HIDDEN) * 2
                        + (HIDDEN + OUT_PAD) * 4))

    out = pl.pallas_call(
        kernel,
        out_shape=jax.ShapeDtypeStruct((NCLASS, N), jnp.float32),
        grid_spec=pltpu.PrefetchScalarGridSpec(
            num_scalar_prefetch=0,
            grid=grid,
            in_specs=[
                pl.BlockSpec((FEAT_PAD, tile), lambda i: (0, i)),    # packed x
                pl.BlockSpec((HIDDEN, FEAT_PAD), lambda i: (0, 0)),  # W1^T (+b1)
                pl.BlockSpec((HIDDEN, HIDDEN), lambda i: (0, 0)),    # W2^T
                pl.BlockSpec((HIDDEN, 1), lambda i: (0, 0)),         # b2
                pl.BlockSpec((OUT_PAD, HIDDEN), lambda i: (0, 0)),   # W3^T pad
                pl.BlockSpec((OUT_PAD, 1), lambda i: (0, 0)),        # b3 pad
            ],
            out_specs=pl.BlockSpec((NCLASS, tile), lambda i: (0, i)),
        ),
        compiler_params=pltpu.CompilerParams(
            dimension_semantics=("parallel",)),
        cost_estimate=cost,
    )(x_packed, w1t, w2t, b2c, w3p, b3p)

    if channel_major_output:
        # downstream consumers that can take channel-major avoid an extra HBM
        # relayout of the output
        return out
    return out.T.reshape(B, P, S, NCLASS)


def binary_decoder_ref(input_cat, must_1_flag, params, *, logit_clipping=10.0,
                       matmul_dtype=jnp.float32):
    """Pure-JAX reference mirroring the PyTorch forward.

    matmul_dtype=jnp.bfloat16 reproduces the kernel's mixed-precision scheme
    (including b1 being carried through the bf16 layer-1 matmul).
    """
    w1, b1, w2, b2, w3, b3 = params
    md = matmul_dtype
    x = input_cat.astype(jnp.float32)
    b1_eff = b1.astype(md).astype(jnp.float32)   # kernel folds b1 into W1 (md)
    h1 = jnp.maximum(jnp.dot(x.astype(md), w1.astype(md),
                             preferred_element_type=jnp.float32) + b1_eff, 0.0)
    h2 = jnp.maximum(jnp.dot(h1.astype(md), w2.astype(md),
                             preferred_element_type=jnp.float32) + b2, 0.0)
    s = jnp.dot(h2.astype(md), w3.astype(md),
                preferred_element_type=jnp.float32) + b3
    s = logit_clipping * jnp.tanh(s)
    ninf = jnp.where(must_1_flag[..., None] & (jnp.arange(NCLASS) == 0),
                     -jnp.inf, 0.0)
    return jax.nn.softmax(s + ninf, axis=-1)


if __name__ == "__main__":
    key = jax.random.PRNGKey(0)
    kx, kf, kp = jax.random.split(key, 3)

    # [batch, pomo, seq, 6] -> N = 1024 rows -> 2 grid steps (tile = 512)
    B, P, S = 2, 8, 64
    input_cat = jax.random.normal(kx, (B, P, S, FEAT), jnp.float32)
    must_1_flag = jax.random.bernoulli(kf, 0.3, (B, P, S))
    params = make_params(kp)

    probs = binary_decoder(input_cat, must_1_flag, params, logit_clipping=10.0)
    probs = jax.block_until_ready(probs)
    assert probs.shape == (B, P, S, NCLASS)

    # tight check vs a reference that uses the same bf16 matmul operands
    ref_bf16 = binary_decoder_ref(input_cat, must_1_flag, params,
                                  logit_clipping=10.0,
                                  matmul_dtype=jnp.bfloat16)
    assert jnp.allclose(probs, ref_bf16, atol=5e-3, rtol=0.0)

    # loose check vs the full-f32 PyTorch-equivalent reference
    # (bf16 matmuls + 10x tanh amplification -> relaxed tolerance)
    ref_f32 = binary_decoder_ref(input_cat, must_1_flag, params,
                                 logit_clipping=10.0,
                                 matmul_dtype=jnp.float32)
    assert jnp.allclose(probs, ref_f32, atol=5e-2, rtol=0.0)

    # rows with must_1_flag must put ALL probability on channel 1 (exactly)
    assert jnp.allclose(jnp.where(must_1_flag, probs[..., 0], 0.0), 0.0)
    # probabilities sum to 1 (p0 is computed as 1 - p1, so this is exact)
    assert jnp.allclose(probs.sum(-1), 1.0, atol=1e-6)

    print("KERNEL_OK")
</pallas_src>

<mosaic_0001>
module attributes {stable_mosaic.version = 11 : i64} {
  func.func @_decoder_kernel(%arg0: i32, %arg1: memref<8x512xbf16, #tpu.memory_space<vmem>>, %arg2: memref<128x8xbf16, #tpu.memory_space<vmem>>, %arg3: memref<128x128xbf16, #tpu.memory_space<vmem>>, %arg4: memref<128x1xf32, #tpu.memory_space<vmem>>, %arg5: memref<8x128xbf16, #tpu.memory_space<vmem>>, %arg6: memref<8x1xf32, #tpu.memory_space<vmem>>, %arg7: memref<2x512xf32, #tpu.memory_space<vmem>>) attributes {dimension_semantics = [#tpu.dimension_semantics<parallel>], iteration_bounds = array<i64: 2>, scalar_prefetch = 0 : i64, scratch_operands = 0 : i64, tpu.core_type = #tpu.core_type<tc>, window_params = [{transform_indices = @transform_0, window_bounds = array<i64: 8, 512>}, {pipeline_mode = #tpu.pipeline_mode<synchronous>, transform_indices = @transform_1, window_bounds = array<i64: 128, 8>}, {pipeline_mode = #tpu.pipeline_mode<synchronous>, transform_indices = @transform_2, window_bounds = array<i64: 128, 128>}, {pipeline_mode = #tpu.pipeline_mode<synchronous>, transform_indices = @transform_3, window_bounds = array<i64: 128, 1>}, {pipeline_mode = #tpu.pipeline_mode<synchronous>, transform_indices = @transform_4, window_bounds = array<i64: 8, 128>}, {pipeline_mode = #tpu.pipeline_mode<synchronous>, transform_indices = @transform_5, window_bounds = array<i64: 8, 1>}, {transform_indices = @transform_6, window_bounds = array<i64: 2, 512>}]} {
    %c0 = arith.constant 0 : index
    %c0_0 = arith.constant 0 : index
    %0 = vector.load %arg1[%c0, %c0_0] : memref<8x512xbf16, #tpu.memory_space<vmem>>, vector<8x512xbf16>
    %1 = vector.extract_strided_slice %0 {offsets = [6, 0], sizes = [1, 512], strides = [1, 1]} : vector<8x512xbf16> to vector<1x512xbf16>
    %2 = arith.extf %1 : vector<1x512xbf16> to vector<1x512xf32>
    %c0_1 = arith.constant 0 : index
    %c0_2 = arith.constant 0 : index
    %3 = vector.load %arg2[%c0_1, %c0_2] : memref<128x8xbf16, #tpu.memory_space<vmem>>, vector<128x8xbf16>
    %cst = arith.constant dense<0.000000e+00> : vector<128x512xf32>
    %4 = tpu.matmul %3, %0, %cst {dimension_numbers = #tpu.dot_dimension_numbers<[1], [0], [0], [1], [0, 0, 1, 1], [], []>} : vector<128x8xbf16>, vector<8x512xbf16>, vector<128x512xf32> -> vector<128x512xf32>
    %cst_3 = arith.constant 0.000000e+00 : f32
    %5 = vector.broadcast %cst_3 : f32 to vector<128x512xf32>
    %6 = arith.maximumf %4, %5 : vector<128x512xf32>
    %c0_4 = arith.constant 0 : index
    %c0_5 = arith.constant 0 : index
    %7 = vector.load %arg3[%c0_4, %c0_5] : memref<128x128xbf16, #tpu.memory_space<vmem>>, vector<128x128xbf16>
    %8 = arith.truncf %6 : vector<128x512xf32> to vector<128x512xbf16>
    %cst_6 = arith.constant dense<0.000000e+00> : vector<128x512xf32>
    %9 = tpu.matmul %7, %8, %cst_6 {dimension_numbers = #tpu.dot_dimension_numbers<[1], [0], [0], [1], [0, 0, 1, 1], [], []>} : vector<128x128xbf16>, vector<128x512xbf16>, vector<128x512xf32> -> vector<128x512xf32>
    %c0_7 = arith.constant 0 : index
    %c0_8 = arith.constant 0 : index
    %10 = vector.load %arg4[%c0_7, %c0_8] : memref<128x1xf32, #tpu.memory_space<vmem>>, vector<128x1xf32>
    %11 = vector.broadcast %10 : vector<128x1xf32> to vector<128x512xf32>
    %12 = arith.addf %9, %11 : vector<128x512xf32>
    %cst_9 = arith.constant 0.000000e+00 : f32
    %13 = vector.broadcast %cst_9 : f32 to vector<128x512xf32>
    %14 = arith.maximumf %12, %13 : vector<128x512xf32>
    %c0_10 = arith.constant 0 : index
    %c0_11 = arith.constant 0 : index
    %15 = vector.load %arg5[%c0_10, %c0_11] : memref<8x128xbf16, #tpu.memory_space<vmem>>, vector<8x128xbf16>
    %16 = arith.truncf %14 : vector<128x512xf32> to vector<128x512xbf16>
    %cst_12 = arith.constant dense<0.000000e+00> : vector<8x512xf32>
    %17 = tpu.matmul %15, %16, %cst_12 {dimension_numbers = #tpu.dot_dimension_numbers<[1], [0], [0], [1], [0, 0, 1, 1], [], []>} : vector<8x128xbf16>, vector<128x512xbf16>, vector<8x512xf32> -> vector<8x512xf32>
    %c0_13 = arith.constant 0 : index
    %c0_14 = arith.constant 0 : index
    %18 = vector.load %arg6[%c0_13, %c0_14] : memref<8x1xf32, #tpu.memory_space<vmem>>, vector<8x1xf32>
    %19 = vector.broadcast %18 : vector<8x1xf32> to vector<8x512xf32>
    %20 = arith.addf %17, %19 : vector<8x512xf32>
    %21 = vector.extract_strided_slice %20 {offsets = [0, 0], sizes = [2, 512], strides = [1, 1]} : vector<8x512xf32> to vector<2x512xf32>
    %22 = math.tanh %21 : vector<2x512xf32>
    %cst_15 = arith.constant 1.000000e+01 : f32
    %23 = vector.broadcast %cst_15 : f32 to vector<2x512xf32>
    %24 = arith.mulf %23, %22 : vector<2x512xf32>
    %25 = vector.extract_strided_slice %24 {offsets = [1, 0], sizes = [1, 512], strides = [1, 1]} : vector<2x512xf32> to vector<1x512xf32>
    %26 = vector.extract_strided_slice %24 {offsets = [0, 0], sizes = [1, 512], strides = [1, 1]} : vector<2x512xf32> to vector<1x512xf32>
    %27 = arith.subf %25, %26 : vector<1x512xf32>
    %cst_16 = arith.constant 0.000000e+00 : f32
    %28 = vector.broadcast %cst_16 : f32 to vector<1x512xf32>
    %29 = arith.subf %28, %27 : vector<1x512xf32>
    %30 = math.exp %29 : vector<1x512xf32>
    %cst_17 = arith.constant 1.000000e+00 : f32
    %31 = vector.broadcast %cst_17 : f32 to vector<1x512xf32>
    %32 = arith.addf %31, %30 : vector<1x512xf32>
    %33 = tpu.reciprocal %32 {approx = true} : vector<1x512xf32> -> vector<1x512xf32>
    %cst_18 = arith.constant 5.000000e-01 : f32
    %34 = vector.broadcast %cst_18 : f32 to vector<1x512xf32>
    %35 = arith.cmpf ogt, %2, %34 : vector<1x512xf32>
    %cst_19 = arith.constant 1.000000e+00 : f32
    %36 = vector.broadcast %cst_19 : f32 to vector<1x512xf32>
    %37 = arith.select %35, %36, %33 : vector<1x512xi1>, vector<1x512xf32>
    %cst_20 = arith.constant 1.000000e+00 : f32
    %38 = vector.broadcast %cst_20 : f32 to vector<1x512xf32>
    %39 = arith.subf %38, %37 : vector<1x512xf32>
    %c0_21 = arith.constant 0 : index
    %c0_22 = arith.constant 0 : index
    %40 = vector.load %arg7[%c0_21, %c0_22] : memref<2x512xf32, #tpu.memory_space<vmem>>, vector<1x512xf32>
    tpu.vector_store %arg7[%c0_21, %c0_22], %39 {strides = array<i32>} : memref<2x512xf32, #tpu.memory_space<vmem>>, vector<1x512xf32>,
    %c1 = arith.constant 1 : index
    %c0_23 = arith.constant 0 : index
    %41 = vector.load %arg7[%c1, %c0_23] : memref<2x512xf32, #tpu.memory_space<vmem>>, vector<1x512xf32>
    tpu.vector_store %arg7[%c1, %c0_23], %37 {strides = array<i32>} : memref<2x512xf32, #tpu.memory_space<vmem>>, vector<1x512xf32>,
    return
  }
  func.func @transform_0(%arg0: i32) -> (i32, i32) {
    %c0_i32 = arith.constant 0 : i32
    %c0_i32_0 = arith.constant 0 : i32
    return %c0_i32, %arg0 : i32, i32
  }
  func.func @transform_1(%arg0: i32) -> (i32, i32) {
    %c0_i32 = arith.constant 0 : i32
    %c0_i32_0 = arith.constant 0 : i32
    %c0_i32_1 = arith.constant 0 : i32
    return %c0_i32, %c0_i32_0 : i32, i32
  }
  func.func @transform_2(%arg0: i32) -> (i32, i32) {
    %c0_i32 = arith.constant 0 : i32
    %c0_i32_0 = arith.constant 0 : i32
    %c0_i32_1 = arith.constant 0 : i32
    return %c0_i32, %c0_i32_0 : i32, i32
  }
  func.func @transform_3(%arg0: i32) -> (i32, i32) {
    %c0_i32 = arith.constant 0 : i32
    %c0_i32_0 = arith.constant 0 : i32
    %c0_i32_1 = arith.constant 0 : i32
    return %c0_i32, %c0_i32_0 : i32, i32
  }
  func.func @transform_4(%arg0: i32) -> (i32, i32) {
    %c0_i32 = arith.constant 0 : i32
    %c0_i32_0 = arith.constant 0 : i32
    %c0_i32_1 = arith.constant 0 : i32
    return %c0_i32, %c0_i32_0 : i32, i32
  }
  func.func @transform_5(%arg0: i32) -> (i32, i32) {
    %c0_i32 = arith.constant 0 : i32
    %c0_i32_0 = arith.constant 0 : i32
    %c0_i32_1 = arith.constant 0 : i32
    return %c0_i32, %c0_i32_0 : i32, i32
  }
  func.func @transform_6(%arg0: i32) -> (i32, i32) {
    %c0_i32 = arith.constant 0 : i32
    %c0_i32_0 = arith.constant 0 : i32
    return %c0_i32, %arg0 : i32, i32
  }
}

</mosaic_0001>

<bundles_post_ra>
// kernel: tpu_custom_call.1
= control target key start
LH: loop header
LB: loop body
LE: loop exit
PB: predicated region body
PF: predicated region fallthrough
CT: control target
= control target key end

     0   :  { %11 = vsyncpa [#allocation3], 0  ;;  %s2259_s0 = inlined_call_operand.vmem [shape: bf16[8,1024], index: 0, kind: input, shape index: {}]   ;;  %s2260_s1 = inlined_call_operand.vmem [shape: bf16[128,8], index: 1, kind: input, shape index: {}]   ;;  %s2261_s2 = inlined_call_operand.vmem [shape: bf16[128,128], index: 2, kind: input, shape index: {}]   ;;  %s2262_s3 = inlined_call_operand.vmem [shape: f32[128,1], index: 3, kind: input, shape index: {}]   ;;  %s2263_s4 = inlined_call_operand.vmem [shape: bf16[8,128], index: 4, kind: input, shape index: {}]   ;;  %s2264_s5 = inlined_call_operand.vmem [shape: f32[8,1], index: 5, kind: input, shape index: {}]   ;;  %s2265_s6 = inlined_call_operand.hbm [shape: f32[2,1024], index: 6, kind: output, shape index: {}]  }
   0x1   :  { %13 = vsyncpa [#allocation3 + $0x1], 0  ;;  %s1707_s21 = smov 0   ;;  %s1709_s22 = smov 0  }
   0x2   :  { %s1711_s23 = smov 0   ;;  %s1713_s24 = smov 0  }
   0x3 LB: > { %s1728_s25 = sadd.s32 4294967295, %s1667_s24   ;;  %s1466_s26 = sadd.s32 4294967294, %s1667_s24   ;;  %s1667_s24 = sphi %s1713_s24, %s2334_s24   ;;  %s1663_s23 = sphi %s1711_s23, %s2333_s23   ;;  %s1659_s22 = sphi %s1709_s22, %s2332_s22   ;;  %s1655_s21 = sphi %s1707_s21, %s2331_s21  }
   0x4   : > { %s1732_s27 = sadd.s32 1, %s1667_s24   ;;  %s157_s28 = sadd.s32 1, %s1663_s23 }
   0x5   : > { %s154_s29 = ssub.s32 %s1667_s24, %s1732_s27  ;;  %p167_p0 = scmp.ne.s32.totalorder %s1663_s23, %s1659_s22 }
   0x6   : > { %p155_p1 = scmp.eq.s32.totalorder %s154_s29, 0  ;;  %p168_p2 = scmp.eq.s32.totalorder %s1728_s25, 1 }
   0x7   : > { %p173_p3 = scmp.ne.s32.totalorder %s1659_s22, %s1655_s21  ;;  %p174_p4 = scmp.eq.s32.totalorder %s1466_s26, 1 }
   0x8   : > { %s1743_s30 = scalar_select %p155_p1, %s1663_s23, %s157_s28  }
   0x9   : > { %p1745_p5 = por %p168_p2, %p167_p0  ;;  %p1749_p6 = por %p174_p4, %p173_p3 }
   0xa   : > { %p1469_p7 = scmp.ge.s32.totalorder %s1667_s24, 1  ;;  %p216_p8 = scmp.lt.s32.totalorder %s1667_s24, 3 }
   0xc   : > { %p217_p9 = pnand %p1469_p7, %p216_p8 }
   0xe   : > { %220 = sbr.rel (%p217_p9) target bundleno = 896 (0x380), region = 44 }
  0x13   : > { %s1471_s9 = sshll.u32 %s1728_s25, 2  ;;  %v2266_v0 = vmov 0   ;;  %vm351_vm0 = vcmask 1043456   ;;  %v1565_v9 = vld [vmem:[%s2260_s1] sm:$0xff]   ;;  %vm326_vm1 = vcmask 64512   ;;  %v1566_v10 = vld [vmem:[%s2260_s1 + $0x8] sm:$0xff]  }
  0x14   : > { %p247_p10 = scmp.lt.s32.totalorder %s1471_s9, 7  ;;  %396 = vmatprep.mubr.bf16.mxu0 %v2266_v0  ;;  %509 = vmatprep.mubr.bf16.mxu1 %v2266_v0  ;;  %v1567_v11 = vld [vmem:[%s2260_s1 + $0x10] sm:$0xff]   ;;  %v1568_v12 = vld [vmem:[%s2260_s1 + $0x18] sm:$0xff]   ;;  %v1569_v13 = vld [vmem:[%s2260_s1 + $0x20] sm:$0xff]   ;;  %s1517_s12 = sshll.u32 %s1728_s25, 7 }
  0x15   : > { %1559 = vset.pattern.permute.xlu0 %v2266_v0  ;;  %1560 = vset.pattern.permute.xlu1 %v2266_v0  ;;  %v1570_v14 = vld [vmem:[%s2260_s1 + $0x28] sm:$0xff]   ;;  %v1571_v15 = vld [vmem:[%s2260_s1 + $0x30] sm:$0xff]   ;;  %v1572_v16 = vld [vmem:[%s2260_s1 + $0x38] sm:$0xff]   ;;  %s1405_s18 = scalar_lea.hbm %s2265_s6, %s1517_s12  ;;  %s1671_s26 = smov [#allocation2]  }
  0x16   : > { %s2336_s9 = smov (!%p247_p10, %s1471_s9), 7  ;;  %v716_v41 = vld [vmem:[%s2262_s3 + $0x70] sm:$0xff]  ;;  %v714_v42 = vld [vmem:[%s2262_s3 + $0x60] sm:$0xff]  ;;  %v717_v49 = vld [vmem:[%s2262_s3 + $0x78] sm:$0xff]  ;;  %s1611_s25 = sshll.u32 %s1671_s26, 4  ;;  %s1612_s25 = int_to_ptr.vmem [resolvable:$false] %s1611_s25 }
  0x17   : > { %s1472_s10 = sshll.u32 %s2336_s9, 2  ;;  %790 = vperm.xlu0 %1559, %v716_v41   ;;  %780 = vperm.xlu1 %1560, %v714_v42   ;;  %s1613_s28 = scalar_lea.vmem %s1612_s25, 256 }
  0x18   : > { %s1763_s13 = scalar_lea.vmem %s2259_s0, %s1472_s10 }
  0x19   : > { %v254_v1 = vld [vmem:[%s1763_s13] sm:$0xff]  ;;  %v255_v2 = vld [vmem:[%s1763_s13 + $0x8] sm:$0xff] }
  0x1a   : > { %v1482_v3 = vcombine.high %v254_v1, %v254_v1  ;;  %v1484_v4 = vcombine.high %v255_v2, %v255_v2  ;;  %v1481_v5 = vcombine.low %v254_v1, %v254_v1  ;;  %v1483_v6 = vcombine.low %v255_v2, %v255_v2  ;;  %v715_v1 = vld [vmem:[%s2262_s3 + $0x68] sm:$0xff]  ;;  %v712_v2 = vld [vmem:[%s2262_s3 + $0x50] sm:$0xff] }
  0x1b   : > { %795 = vperm.xlu0 %1559, %v717_v49   ;;  %785 = vperm.xlu1 %1560, %v715_v1  }
  0x1c   : > { %1485 = vmatprep.subr.msk.bf16.mxu0 %vm351_vm0, %v1482_v3  ;;  %1494 = vmatprep.subr.msk.bf16.mxu1 %vm351_vm0, %v1484_v4  ;;  %v353_v7 = vsel %vm351_vm0, %v1481_v5, 0  ;;  %v359_v8 = vsel %vm351_vm0, %v1483_v6, 0  ;;  %v713_v5 = vld [vmem:[%s2262_s3 + $0x58] sm:$0xff]  ;;  %v710_v6 = vld [vmem:[%s2262_s3 + $0x40] sm:$0xff] }
  0x1d   : > { %379 = vmatpush1.bf16.msra.mxu0 %v353_v7  ;;  %492 = vmatpush1.bf16.msra.mxu1 %v359_v8 }
  0x1f   : > { %770 = vperm.xlu0 %1559, %v712_v2   ;;  %775 = vperm.xlu1 %1560, %v713_v5  }
  0x20   : > { %1486 = vmatmul.mubr.msk.bf16.vlgmr.msra.gmra.mxu0 %vm326_vm1, %v1565_v9  ;;  %1495 = vmatmul.mubr.msk.bf16.vlgmr.msra.gmra.mxu1 %vm326_vm1, %v1565_v9 }
  0x21   : > { %406 = vmatprep.mubr.bf16.mxu0 %v2266_v0  ;;  %519 = vmatprep.mubr.bf16.mxu1 %v2266_v0 }
  0x23   : > { %760 = vperm.xlu0 %1559, %v710_v6  }
  0x28   : > { %1487 = vmatmul.mubr.msk.bf16.gmra.mxu0 %vm326_vm1, %v1566_v10  ;;  %1496 = vmatmul.mubr.msk.bf16.gmra.mxu1 %vm326_vm1, %v1566_v10 }
  0x29   : > { %416 = vmatprep.mubr.bf16.mxu0 %v2266_v0  ;;  %529 = vmatprep.mubr.bf16.mxu1 %v2266_v0 }
  0x30   : > { %1488 = vmatmul.mubr.msk.bf16.gmra.mxu0 %vm326_vm1, %v1567_v11  ;;  %1497 = vmatmul.mubr.msk.bf16.gmra.mxu1 %vm326_vm1, %v1567_v11 }
  0x31   : > { %426 = vmatprep.mubr.bf16.mxu0 %v2266_v0  ;;  %539 = vmatprep.mubr.bf16.mxu1 %v2266_v0 }
  0x38   : > { %1489 = vmatmul.mubr.msk.bf16.gmra.mxu0 %vm326_vm1, %v1568_v12  ;;  %1498 = vmatmul.mubr.msk.bf16.gmra.mxu1 %vm326_vm1, %v1568_v12 }
  0x39   : > { %436 = vmatprep.mubr.bf16.mxu0 %v2266_v0  ;;  %549 = vmatprep.mubr.bf16.mxu1 %v2266_v0 }
  0x40   : > { %1490 = vmatmul.mubr.msk.bf16.gmra.mxu0 %vm326_vm1, %v1569_v13  ;;  %1499 = vmatmul.mubr.msk.bf16.gmra.mxu1 %vm326_vm1, %v1569_v13  ;;  %v711_v13 = vld [vmem:[%s2262_s3 + $0x48] sm:$0xff] }
  0x41   : > { %446 = vmatprep.mubr.bf16.mxu0 %v2266_v0  ;;  %559 = vmatprep.mubr.bf16.mxu1 %v2266_v0 }
  0x42   : > { %765 = vperm.xlu1 %1560, %v711_v13  }
  0x48   : > { %1491 = vmatmul.mubr.msk.bf16.gmra.mxu0 %vm326_vm1, %v1570_v14  ;;  %1500 = vmatmul.mubr.msk.bf16.gmra.mxu1 %vm326_vm1, %v1570_v14  ;;  %v708_v14 = vld [vmem:[%s2262_s3 + $0x30] sm:$0xff] }
  0x49   : > { %456 = vmatprep.mubr.bf16.mxu0 %v2266_v0  ;;  %569 = vmatprep.mubr.bf16.mxu1 %v2266_v0 }
  0x4a   : > { %750 = vperm.xlu0 %1559, %v708_v14  }
  0x50   : > { %1492 = vmatmul.mubr.msk.bf16.gmra.mxu0 %vm326_vm1, %v1571_v15  ;;  %1501 = vmatmul.mubr.msk.bf16.gmra.mxu1 %vm326_vm1, %v1571_v15 }
  0x51   : > { %466 = vmatprep.mubr.bf16.mxu0 %v2266_v0  ;;  %579 = vmatprep.mubr.bf16.mxu1 %v2266_v0 }
  0x58   : > { %1493 = vmatmul.mubr.msk.bf16.gmra.mxu0 %vm326_vm1, %v1572_v16  ;;  %1502 = vmatmul.mubr.msk.bf16.gmra.mxu1 %vm326_vm1, %v1572_v16 }
  0x59   : > { %878 = vmatprep.mubr.bf16.mxu0 %v2266_v0  ;;  %991 = vmatprep.mubr.bf16.mxu1 %v2266_v0 }
  0xe0   : > { %v398_v17 = vpop.f32.mrf.mxu0  ;;  %v511_v18 = vpop.f32.mrf.mxu1 }
  0xe1   : > { %v590_v23 = vmax.f32 %v398_v17, 0.0  ;;  %v592_v24 = vmax.f32 %v511_v18, 0.0  ;;  %v709_v17 = vld [vmem:[%s2262_s3 + $0x38] sm:$0xff]  ;;  %v706_v18 = vld [vmem:[%s2262_s3 + $0x20] sm:$0xff] }
  0xe2   : > { %v400_v19 = vpop.f32.mrf.mxu0  ;;  %v513_v20 = vpop.f32.mrf.mxu1  ;;  %755 = vperm.xlu1 %1560, %v709_v17   ;;  %740 = vperm.xlu0 %1559, %v706_v18  }
  0xe3   : > { %v591_v27 = vmax.f32 %v400_v19, 0.0  ;;  %v593_v28 = vmax.f32 %v513_v20, 0.0 }
  0xe4   : > { %v402_v21 = vpop.f32.mrf.mxu0  ;;  %v515_v22 = vpop.f32.mrf.mxu1 }
  0xe5   : > { %v594_v25 = vmax.f32 %v402_v21, 0.0  ;;  %v596_v26 = vmax.f32 %v515_v22, 0.0 }
  0xe6   : > { %v404_v29 = vpop.f32.mrf.mxu0  ;;  %v517_v30 = vpop.f32.mrf.mxu1 }
  0xe7   : > { %v1823_v31 = vpack.c.bf16 %v594_v25, %v590_v23  ;;  %v1825_v32 = vpack.c.bf16 %v596_v26, %v592_v24  ;;  %v595_v33 = vmax.f32 %v404_v29, 0.0  ;;  %v597_v34 = vmax.f32 %v517_v30, 0.0  ;;  %v707_v23 = vld [vmem:[%s2262_s3 + $0x28] sm:$0xff]  ;;  %v704_v24 = vld [vmem:[%s2262_s3 + $0x10] sm:$0xff]  ;;  %v705_v29 = vld [vmem:[%s2262_s3 + $0x18] sm:$0xff] }
  0xe8   : > { %v408_v35 = vpop.f32.mrf.mxu0  ;;  %v521_v36 = vpop.f32.mrf.mxu1  ;;  %745 = vperm.xlu1 %1560, %v707_v23   ;;  %730 = vperm.xlu0 %1559, %v704_v24   ;;  %v702_v30 = vld [vmem:[%s2262_s3] sm:$0xff] }
  0xe9   : > { %2272 = vst [vmem:[#allocation5_spill] sm:$0xff] %v1823_v31  ;;  %2273 = vst [vmem:[#allocation6_spill] sm:$0xff] %v1825_v32  ;;  %v1827_v37 = vpack.c.bf16 %v595_v33, %v591_v27  ;;  %v1829_v38 = vpack.c.bf16 %v597_v34, %v593_v28  ;;  %v598_v45 = vmax.f32 %v408_v35, 0.0  ;;  %v600_v46 = vmax.f32 %v521_v36, 0.0 }
  0xea   : > { %v410_v39 = vpop.f32.mrf.mxu0  ;;  %v523_v40 = vpop.f32.mrf.mxu1 }
  0xeb   : > { %2274 = vst [vmem:[#allocation7_spill] sm:$0xff] %v1827_v37  ;;  %2275 = vst [vmem:[#allocation8_spill] sm:$0xff] %v1829_v38  ;;  %v599_v50 = vmax.f32 %v410_v39, 0.0  ;;  %v601_v51 = vmax.f32 %v523_v40, 0.0  ;;  %v703_v39 = vld [vmem:[%s2262_s3 + $0x8] sm:$0xff]  ;;  %v1169_v40 = vld [vmem:[%s2264_s5] sm:$0xff] }
  0xec   : > { %v412_v43 = vpop.f32.mrf.mxu0  ;;  %v525_v44 = vpop.f32.mrf.mxu1  ;;  %735 = vperm.xlu1 %1560, %v705_v29   ;;  %720 = vperm.xlu0 %1559, %v702_v30  }
  0xed   : > { %v602_v47 = vmax.f32 %v412_v43, 0.0  ;;  %v604_v48 = vmax.f32 %v525_v44, 0.0 }
  0xee   : > { %v414_v52 = vpop.f32.mrf.mxu0  ;;  %v527_v53 = vpop.f32.mrf.mxu1 }
  0xef   : > { %v1840_v54 = vpack.c.bf16 %v602_v47, %v598_v45  ;;  %v1842_v55 = vpack.c.bf16 %v604_v48, %v600_v46  ;;  %v603_v56 = vmax.f32 %v414_v52, 0.0  ;;  %v605_v57 = vmax.f32 %v527_v53, 0.0 }
  0xf0   : > { %v1844_v58 = vpop.f32.mrf.mxu0  ;;  %v1846_v59 = vpop.f32.mrf.mxu1  ;;  %725 = vperm.xlu1 %1560, %v703_v39   ;;  %1172 = vperm.xlu0 %1559, %v1169_v40  }
  0xf1   : > { %2276 = vst [vmem:[#allocation9_spill] sm:$0xff] %v1840_v54  ;;  %2277 = vst [vmem:[#allocation10_spill] sm:$0xff] %v1842_v55  ;;  %v1848_v60 = vpack.c.bf16 %v603_v56, %v599_v50  ;;  %v1850_v61 = vpack.c.bf16 %v605_v57, %v601_v51 }
  0xf2   : > { %2278 = vst [vmem:[#allocation11_spill] sm:$0xff] %v1844_v58  ;;  %2279 = vst [vmem:[#allocation12_spill] sm:$0xff] %v1846_v59  ;;  %v1852_v62 = vpop.f32.mrf.mxu0  ;;  %v1854_v63 = vpop.f32.mrf.mxu1 }
  0xf3   : > { %2280 = vst [vmem:[#allocation13_spill] sm:$0xff] %v1848_v60  ;;  %2281 = vst [vmem:[#allocation14_spill] sm:$0xff] %v1850_v61 }
  0xf4   : > { %v1862_v3 = vpop.f32.mrf.mxu0  ;;  %v1864_v4 = vpop.f32.mrf.mxu1 }
  0xf6   : > { %v1872_v7 = vpop.f32.mrf.mxu0  ;;  %v1874_v8 = vpop.f32.mrf.mxu1 }
  0xf8   : > { %v1876_v9 = vpop.f32.mrf.mxu0  ;;  %v1878_v10 = vpop.f32.mrf.mxu1 }
  0xfa   : > { %v1880_v11 = vpop.f32.mrf.mxu0  ;;  %v1882_v12 = vpop.f32.mrf.mxu1 }
  0xfc   : > { %v1890_v15 = vpop.f32.mrf.mxu0  ;;  %v1892_v16 = vpop.f32.mrf.mxu1 }
  0xfe   : > { %v1900_v19 = vpop.f32.mrf.mxu0  ;;  %v1902_v20 = vpop.f32.mrf.mxu1 }
 0x100   : > { %v1904_v21 = vpop.f32.mrf.mxu0  ;;  %v1906_v22 = vpop.f32.mrf.mxu1 }
 0x102   : > { %v1914_v25 = vpop.f32.mrf.mxu0  ;;  %v1916_v26 = vpop.f32.mrf.mxu1 }
 0x104   : > { %v1918_v27 = vpop.f32.mrf.mxu0  ;;  %v1920_v28 = vpop.f32.mrf.mxu1 }
 0x106   : > { %v1928_v33 = vpop.f32.mrf.mxu0  ;;  %v1930_v34 = vpop.f32.mrf.mxu1 }
 0x108   : > { %v1932_v35 = vpop.f32.mrf.mxu0  ;;  %v1934_v36 = vpop.f32.mrf.mxu1 }
 0x10a   : > { %v1942_v41 = vpop.f32.mrf.mxu0  ;;  %v1944_v42 = vpop.f32.mrf.mxu1 }
 0x10c   : > { %v1946_v43 = vpop.f32.mrf.mxu0  ;;  %v1948_v44 = vpop.f32.mrf.mxu1 }
 0x10e   : > { %v454_v45 = vpop.f32.mrf.mxu0  ;;  %v567_v46 = vpop.f32.mrf.mxu1 }
 0x110   : > { %v458_v47 = vpop.f32.mrf.mxu0  ;;  %v571_v48 = vpop.f32.mrf.mxu1 }
 0x112   : > { %v460_v49 = vpop.f32.mrf.mxu0  ;;  %v573_v50 = vpop.f32.mrf.mxu1 }
 0x113   : > { %v639_v38 = vmax.f32 %v460_v49, 0.0  ;;  %v641_v37 = vmax.f32 %v573_v50, 0.0  ;;  %v633_v49 = vmax.f32 %v1944_v42, 0.0  ;;  %v625_v42 = vmax.f32 %v1916_v26, 0.0 }
 0x114   : > { %v462_v51 = vpop.f32.mrf.mxu0  ;;  %v575_v52 = vpop.f32.mrf.mxu1  ;;  %v615_v26 = vmax.f32 %v1880_v11, 0.0  ;;  %v616_v11 = vmax.f32 %v1878_v10, 0.0 }
 0x115   : > { %v642_v61 = vmax.f32 %v462_v51, 0.0  ;;  %v644_v60 = vmax.f32 %v575_v52, 0.0  ;;  %v614_v51 = vmax.f32 %v1876_v9, 0.0 }
 0x116   : > { %v464_v53 = vpop.f32.mrf.mxu0  ;;  %v577_v56 = vpop.f32.mrf.mxu1 }
 0x117   : > { %v643_v14 = vmax.f32 %v464_v53, 0.0  ;;  %v645_v17 = vmax.f32 %v577_v56, 0.0  ;;  %v635_v53 = vmax.f32 %v454_v45, 0.0  ;;  %v637_v56 = vmax.f32 %v567_v46, 0.0 }
 0x118   : > { %v468_v57 = vpop.f32.mrf.mxu0  ;;  %v581_v1 = vpop.f32.mrf.mxu1  ;;  %v622_v46 = vmax.f32 %v1904_v21, 0.0  ;;  %v613_v21 = vmax.f32 %v1874_v8, 0.0 }
 0x119   : > { %v646_v32 = vmax.f32 %v468_v57, 0.0  ;;  %v648_v31 = vmax.f32 %v581_v1, 0.0  ;;  %v631_v57 = vmax.f32 %v1942_v41, 0.0  ;;  %v623_v41 = vmax.f32 %v1914_v25, 0.0 }
 0x11a   : > { %v470_v2 = vpop.f32.mrf.mxu0  ;;  %v583_v5 = vpop.f32.mrf.mxu1  ;;  %v624_v25 = vmax.f32 %v1906_v22, 0.0 }
 0x11b   : > { %v647_v30 = vmax.f32 %v470_v2, 0.0  ;;  %v649_v39 = vmax.f32 %v583_v5, 0.0  ;;  %v638_v2 = vmax.f32 %v458_v47, 0.0  ;;  %v640_v5 = vmax.f32 %v571_v48, 0.0 }
 0x11c   : > { %v472_v6 = vpop.f32.mrf.mxu0  ;;  %v585_v13 = vpop.f32.mrf.mxu1  ;;  %v611_v48 = vmax.f32 %v1872_v7, 0.0  ;;  %v612_v7 = vmax.f32 %v1864_v4, 0.0  ;;  %v2286_v4 = vld [vmem:[#allocation9_spill] sm:$0xff] }
 0x11d   : > { %v650_v18 = vmax.f32 %v472_v6, 0.0  ;;  %v652_v23 = vmax.f32 %v585_v13, 0.0  ;;  %v695_v6 = vpack.c.bf16 %v643_v14, %v639_v38  ;;  %v697_v13 = vpack.c.bf16 %v645_v17, %v641_v37  ;;  %v2282_v17 = vld [vmem:[#allocation11_spill] sm:$0xff] }
 0x11e   : > { %v474_v24 = vpop.f32.mrf.mxu0  ;;  %v587_v29 = vpop.f32.mrf.mxu1  ;;  %v696_v45 = vpack.c.bf16 %v644_v60, %v640_v5  ;;  %v627_v37 = vmax.f32 %v1928_v33, 0.0  ;;  %v629_v38 = vmax.f32 %v1930_v34, 0.0  ;;  %v626_v60 = vmax.f32 %v1918_v27, 0.0  ;;  %v1577_v5 = vld [vmem:[%s2261_s2 + $0x20] sm:$0xff]  }
 0x11f   : > { %v651_v40 = vmax.f32 %v474_v24, 0.0  ;;  %v653_v0 = vmax.f32 %v587_v29, 0.0  ;;  %v698_v59 = vpack.c.bf16 %v650_v18, %v646_v32  ;;  %v700_v58 = vpack.c.bf16 %v652_v23, %v648_v31  ;;  %v2283_v18 = vld [vmem:[#allocation12_spill] sm:$0xff]  ;;  %v2284_v23 = vld [vmem:[#allocation13_spill] sm:$0xff]  ;;  %v2287_v24 = vld [vmem:[#allocation10_spill] sm:$0xff] }
 0x120   : > { %v636_v31 = vmax.f32 %v1948_v44, 0.0  ;;  %v694_v32 = vpack.c.bf16 %v642_v61, %v638_v2  ;;  %v628_v61 = vmax.f32 %v1920_v28, 0.0  ;;  %v687_v44 = vpack.c.bf16 %v627_v37, %v623_v41  ;;  %v2288_v29 = vld [vmem:[#allocation7_spill] sm:$0xff]  ;;  %v1576_v2 = vld [vmem:[%s2261_s2 + $0x18] sm:$0xff]  }
 0x121   : > { %v699_v55 = vpack.c.bf16 %v651_v40, %v647_v30  ;;  %v701_v54 = vpack.c.bf16 %v653_v0, %v649_v39  ;;  %v634_v0 = vmax.f32 %v1946_v43, 0.0  ;;  %v619_v43 = vmax.f32 %v1900_v19, 0.0  ;;  %v2289_v30 = vld [vmem:[#allocation8_spill] sm:$0xff]  ;;  %v1573_v39 = vld [vmem:[%s2261_s2] sm:$0xff]   ;;  %v2290_v40 = vld [vmem:[#allocation5_spill] sm:$0xff] }
 0x122   : > { %v617_v27 = vmax.f32 %v1882_v12, 0.0  ;;  %v618_v28 = vmax.f32 %v1890_v15, 0.0  ;;  %v620_v19 = vmax.f32 %v1892_v16, 0.0  ;;  %v686_v47 = vpack.c.bf16 %v626_v60, %v622_v46 }
 0x123   : > { %846 = vmatprep.subr.bf16.mxu0 %v699_v55  ;;  %959 = vmatprep.subr.bf16.mxu1 %v701_v54  ;;  %v691_v54 = vpack.c.bf16 %v635_v53, %v631_v57  ;;  %v693_v55 = vpack.c.bf16 %v637_v56, %v633_v49  ;;  %v683_v50 = vpack.c.bf16 %v619_v43, %v615_v26  ;;  %v607_v12 = vmax.f32 %v1852_v62, 0.0  ;;  %v2291_v53 = vld [vmem:[#allocation6_spill] sm:$0xff]  ;;  %v1578_v57 = vld [vmem:[%s2261_s2 + $0x28] sm:$0xff]   ;;  %v1579_v49 = vld [vmem:[%s2261_s2 + $0x30] sm:$0xff]  }
 0x124   : > { %847 = vmatpush1.bf16.msra.mxu0 %v698_v59  ;;  %960 = vmatpush1.bf16.msra.mxu1 %v700_v58  ;;  %v630_v58 = vmax.f32 %v1932_v35, 0.0  ;;  %v632_v59 = vmax.f32 %v1934_v36, 0.0  ;;  %v621_v35 = vmax.f32 %v1902_v20, 0.0  ;;  %v689_v36 = vpack.c.bf16 %v629_v38, %v625_v42 }
 0x125   : > { %848 = vmatprep.subr.bf16.mxu0 %v695_v6  ;;  %961 = vmatprep.subr.bf16.mxu1 %v697_v13  ;;  %v688_v20 = vpack.c.bf16 %v628_v61, %v624_v25  ;;  %v609_v15 = vmax.f32 %v1854_v63, 0.0  ;;  %v610_v16 = vmax.f32 %v1862_v3, 0.0  ;;  %v682_v52 = vpack.c.bf16 %v618_v28, %v614_v51  ;;  %v2285_v3 = vld [vmem:[#allocation14_spill] sm:$0xff]  ;;  %v1574_v6 = vld [vmem:[%s2261_s2 + $0x8] sm:$0xff]   ;;  %v1575_v13 = vld [vmem:[%s2261_s2 + $0x10] sm:$0xff]  }
 0x126   : > { %v690_v33 = vpack.c.bf16 %v634_v0, %v630_v58  ;;  %v692_v34 = vpack.c.bf16 %v636_v31, %v632_v59  ;;  %v685_v22 = vpack.c.bf16 %v621_v35, %v617_v27  ;;  %v684_v8 = vpack.c.bf16 %v620_v19, %v616_v11  ;;  %v1580_v0 = vld [vmem:[%s2261_s2 + $0x38] sm:$0xff]   ;;  %v2028_v31 = vpop.permute.xlu0 %790 }
 0x127   : > { %v679_v1 = vpack.c.bf16 %v611_v48, %v607_v12  ;;  %v681_v14 = vpack.c.bf16 %v613_v21, %v609_v15  ;;  %v606_v9 = vmax.f32 %v2282_v17, 0.0  ;;  %v608_v10 = vmax.f32 %v2283_v18, 0.0 }
 0x128   : > { %849 = vmatpush1.bf16.msra.mxu0 %v694_v32  ;;  %962 = vmatpush1.bf16.msra.mxu1 %v696_v45  ;;  %v2292_v56 = vmov 0   ;;  %v2030_v32 = vpop.permute.xlu1 %780 }
 0x129   : > { %850 = vmatprep.subr.bf16.mxu0 %v691_v54  ;;  %963 = vmatprep.subr.bf16.mxu1 %v693_v55  ;;  %v678_v62 = vpack.c.bf16 %v610_v16, %v606_v9  ;;  %v680_v63 = vpack.c.bf16 %v612_v7, %v608_v10 }
 0x12a   : > { %v2032_v45 = vpop.permute.xlu0 %795 }
 0x12c   : > { %851 = vmatpush1.bf16.msra.mxu0 %v690_v33  ;;  %964 = vmatpush1.bf16.msra.mxu1 %v692_v34  ;;  %v2034_v37 = vpop.permute.xlu1 %785 }
 0x12d   : > { %852 = vmatprep.subr.bf16.mxu0 %v687_v44  ;;  %965 = vmatprep.subr.bf16.mxu1 %v689_v36 }
 0x12e   : > { %v2036_v38 = vpop.permute.xlu0 %770 }
 0x130   : > { %853 = vmatpush1.bf16.msra.mxu0 %v686_v47  ;;  %966 = vmatpush1.bf16.msra.mxu1 %v688_v20  ;;  %v2038_v54 = vpop.permute.xlu1 %775 }
 0x131   : > { %854 = vmatprep.subr.bf16.mxu0 %v683_v50  ;;  %967 = vmatprep.subr.bf16.mxu1 %v685_v22 }
 0x132   : > { %v2040_v55 = vpop.permute.xlu0 %760 }
 0x134   : > { %855 = vmatpush1.bf16.msra.mxu0 %v682_v52  ;;  %968 = vmatpush1.bf16.msra.mxu1 %v684_v8  ;;  %v2042_v58 = vpop.permute.xlu1 %765 }
 0x135   : > { %856 = vmatprep.subr.bf16.mxu0 %v679_v1  ;;  %969 = vmatprep.subr.bf16.mxu1 %v681_v14 }
 0x136   : > { %v2044_v59 = vpop.permute.xlu0 %750 }
 0x138   : > { %857 = vmatpush1.bf16.msra.mxu0 %v678_v62  ;;  %970 = vmatpush1.bf16.msra.mxu1 %v680_v63 }
 0x139   : > { %858 = vmatprep.subr.bf16.mxu0 %v2284_v23  ;;  %971 = vmatprep.subr.bf16.mxu1 %v2285_v3 }
 0x13c   : > { %859 = vmatpush1.bf16.msra.mxu0 %v2286_v4  ;;  %972 = vmatpush1.bf16.msra.mxu1 %v2287_v24 }
 0x13d   : > { %860 = vmatprep.subr.bf16.mxu0 %v2288_v29  ;;  %973 = vmatprep.subr.bf16.mxu1 %v2289_v30 }
 0x140   : > { %861 = vmatpush1.bf16.msra.mxu0 %v2290_v40  ;;  %974 = vmatpush1.bf16.msra.mxu1 %v2291_v53 }
 0x143   : > { %879 = vmatmul.mubr.bf16.vlgmr.msra.gmra.mxu0 %v1573_v39  ;;  %992 = vmatmul.mubr.bf16.vlgmr.msra.gmra.mxu1 %v1573_v39 }
 0x144   : > { %888 = vmatprep.mubr.bf16.mxu0 %v2292_v56  ;;  %1001 = vmatprep.mubr.bf16.mxu1 %v2292_v56 }
 0x14b   : > { %889 = vmatmul.mubr.bf16.gmra.mxu0 %v1574_v6  ;;  %1002 = vmatmul.mubr.bf16.gmra.mxu1 %v1574_v6 }
 0x14c   : > { %898 = vmatprep.mubr.bf16.mxu0 %v2292_v56  ;;  %1011 = vmatprep.mubr.bf16.mxu1 %v2292_v56 }
 0x153   : > { %899 = vmatmul.mubr.bf16.gmra.mxu0 %v1575_v13  ;;  %1012 = vmatmul.mubr.bf16.gmra.mxu1 %v1575_v13 }
 0x154   : > { %908 = vmatprep.mubr.bf16.mxu0 %v2292_v56  ;;  %1021 = vmatprep.mubr.bf16.mxu1 %v2292_v56 }
 0x15b   : > { %909 = vmatmul.mubr.bf16.gmra.mxu0 %v1576_v2  ;;  %1022 = vmatmul.mubr.bf16.gmra.mxu1 %v1576_v2 }
 0x15c   : > { %918 = vmatprep.mubr.bf16.mxu0 %v2292_v56  ;;  %1031 = vmatprep.mubr.bf16.mxu1 %v2292_v56 }
 0x15d   : > { %v2046_v41 = vpop.permute.xlu1 %755  ;;  %v2048_v42 = vpop.permute.xlu0 %740 }
 0x15e   : > { %2293 = vst [vmem:[#allocation11_spill] sm:$0xff] %v2048_v42 }
 0x163   : > { %919 = vmatmul.mubr.bf16.gmra.mxu0 %v1577_v5  ;;  %1032 = vmatmul.mubr.bf16.gmra.mxu1 %v1577_v5  ;;  %v2050_v60 = vpop.permute.xlu1 %745  ;;  %v731_v61 = vpop.permute.xlu0 %730 }
 0x164   : > { %928 = vmatprep.mubr.bf16.mxu0 %v2292_v56  ;;  %1041 = vmatprep.mubr.bf16.mxu1 %v2292_v56 }
 0x167   : > { %v736_v33 = vpop.permute.xlu1 %735  ;;  %v721_v34 = vpop.permute.xlu0 %720 }
 0x16b   : > { %929 = vmatmul.mubr.bf16.gmra.mxu0 %v1578_v57  ;;  %1042 = vmatmul.mubr.bf16.gmra.mxu1 %v1578_v57  ;;  %v726_v44 = vpop.permute.xlu1 %725 }
 0x16c   : > { %938 = vmatprep.mubr.bf16.mxu0 %v2292_v56  ;;  %1051 = vmatprep.mubr.bf16.mxu1 %v2292_v56 }
 0x173   : > { %939 = vmatmul.mubr.bf16.gmra.mxu0 %v1579_v49  ;;  %1052 = vmatmul.mubr.bf16.gmra.mxu1 %v1579_v49 }
 0x174   : > { %948 = vmatprep.mubr.bf16.mxu0 %v2292_v56  ;;  %1061 = vmatprep.mubr.bf16.mxu1 %v2292_v56 }
 0x17b   : > { %949 = vmatmul.mubr.bf16.gmra.mxu0 %v1580_v0  ;;  %1062 = vmatmul.mubr.bf16.gmra.mxu1 %v1580_v0 }
 0x17c   : > { %1207 = vmatprep.mubr.bf16.mxu0 %v2292_v56  ;;  %1248 = vmatprep.mubr.bf16.mxu1 %v2292_v56 }
 0x203   : > { %v880_v43 = vpop.f32.mrf.mxu0  ;;  %v993_v35 = vpop.f32.mrf.mxu1 }
 0x204   : > { %v881_v36 = vadd.f32 %v880_v43, %v721_v34  ;;  %v994_v46 = vadd.f32 %v993_v35, %v721_v34 }
 0x205   : > { %v882_v25 = vpop.f32.mrf.mxu0  ;;  %v995_v26 = vpop.f32.mrf.mxu1 }
 0x206   : > { %v883_v27 = vadd.f32 %v882_v25, %v721_v34  ;;  %v996_v28 = vadd.f32 %v995_v26, %v721_v34  ;;  %v1072_v21 = vmax.f32 %v881_v36, 0.0  ;;  %v1074_v50 = vmax.f32 %v994_v46, 0.0 }
 0x207   : > { %v884_v19 = vpop.f32.mrf.mxu0  ;;  %v997_v47 = vpop.f32.mrf.mxu1 }
 0x208   : > { %v885_v20 = vadd.f32 %v884_v19, %v726_v44  ;;  %v998_v48 = vadd.f32 %v997_v47, %v726_v44  ;;  %v1073_v7 = vmax.f32 %v883_v27, 0.0  ;;  %v1075_v52 = vmax.f32 %v996_v28, 0.0 }
 0x209   : > { %v886_v22 = vpop.f32.mrf.mxu0  ;;  %v999_v51 = vpop.f32.mrf.mxu1 }
 0x20a   : > { %v1076_v11 = vmax.f32 %v885_v20, 0.0  ;;  %v1078_v12 = vmax.f32 %v998_v48, 0.0  ;;  %v887_v15 = vadd.f32 %v886_v22, %v726_v44  ;;  %v1000_v16 = vadd.f32 %v999_v51, %v726_v44 }
 0x20b   : > { %v890_v8 = vpop.f32.mrf.mxu0  ;;  %v1003_v1 = vpop.f32.mrf.mxu1 }
 0x20c   : > { %v2052_v14 = vpack.c.bf16 %v1076_v11, %v1072_v21  ;;  %v2054_v17 = vpack.c.bf16 %v1078_v12, %v1074_v50  ;;  %v1077_v9 = vmax.f32 %v887_v15, 0.0  ;;  %v1079_v18 = vmax.f32 %v1000_v16, 0.0 }
 0x20d   : > { %v891_v10 = vadd.f32 %v890_v8, %v731_v61  ;;  %v1004_v62 = vadd.f32 %v1003_v1, %v731_v61  ;;  %v892_v63 = vpop.f32.mrf.mxu0  ;;  %v1005_v23 = vpop.f32.mrf.mxu1 }
 0x20e   : > { %2294 = vst [vmem:[#allocation12_spill] sm:$0xff] %v2052_v14  ;;  %2295 = vst [vmem:[#allocation13_spill] sm:$0xff] %v2054_v17  ;;  %v2056_v3 = vpack.c.bf16 %v1077_v9, %v1073_v7  ;;  %v2058_v4 = vpack.c.bf16 %v1079_v18, %v1075_v52  ;;  %v893_v24 = vadd.f32 %v892_v63, %v731_v61 }
 0x20f   : > { %v1006_v29 = vadd.f32 %v1005_v23, %v731_v61  ;;  %v894_v30 = vpop.f32.mrf.mxu0  ;;  %v1007_v39 = vpop.f32.mrf.mxu1  ;;  %v1080_v56 = vmax.f32 %v891_v10, 0.0  ;;  %v1082_v6 = vmax.f32 %v1004_v62, 0.0 }
 0x210   : > { %2296 = vst [vmem:[#allocation14_spill] sm:$0xff] %v2056_v3  ;;  %2297 = vst [vmem:[#allocation9_spill] sm:$0xff] %v2058_v4  ;;  %v895_v40 = vadd.f32 %v894_v30, %v736_v33  ;;  %v1008_v53 = vadd.f32 %v1007_v39, %v736_v33  ;;  %v1081_v34 = vmax.f32 %v893_v24, 0.0 }
 0x211   : > { %v896_v13 = vpop.f32.mrf.mxu0  ;;  %v1009_v2 = vpop.f32.mrf.mxu1  ;;  %v1083_v43 = vmax.f32 %v1006_v29, 0.0 }
 0x212   : > { %v1084_v5 = vmax.f32 %v895_v40, 0.0  ;;  %v1086_v57 = vmax.f32 %v1008_v53, 0.0  ;;  %v897_v49 = vadd.f32 %v896_v13, %v736_v33  ;;  %v1010_v0 = vadd.f32 %v1009_v2, %v736_v33 }
 0x213   : > { %v2060_v35 = vpop.f32.mrf.mxu0  ;;  %v2062_v44 = vpop.f32.mrf.mxu1 }
 0x214   : > { %2298 = vst [vmem:[#allocation10_spill] sm:$0xff] %v2060_v35  ;;  %2299 = vst [vmem:[#allocation7_spill] sm:$0xff] %v2062_v44  ;;  %v2064_v36 = vpack.c.bf16 %v1084_v5, %v1080_v56  ;;  %v2066_v61 = vpack.c.bf16 %v1086_v57, %v1082_v6  ;;  %v1085_v46 = vmax.f32 %v897_v49, 0.0  ;;  %v1087_v25 = vmax.f32 %v1010_v0, 0.0 }
 0x215   : > { %v902_v26 = vpop.f32.mrf.mxu0  ;;  %v1015_v27 = vpop.f32.mrf.mxu1 }
 0x216   : > { %2300 = vst [vmem:[#allocation8_spill] sm:$0xff] %v2064_v36  ;;  %2301 = vst [vmem:[#allocation5_spill] sm:$0xff] %v2066_v61  ;;  %v2068_v28 = vpack.c.bf16 %v1085_v46, %v1081_v34  ;;  %v2070_v19 = vpack.c.bf16 %v1087_v25, %v1083_v43  ;;  %v2097_v34 = vadd.f32 %v902_v26, %v2048_v42 }
 0x217   : > { %v2072_v47 = vpop.f32.mrf.mxu0  ;;  %v2074_v33 = vpop.f32.mrf.mxu1  ;;  %v2100_v43 = vadd.f32 %v1015_v27, %v2048_v42 }
 0x218   : > { %2302 = vst [vmem:[#allocation6_spill] sm:$0xff] %v2068_v28  ;;  %2303 = vst [vmem:[#allocation15_spill] sm:$0xff] %v2070_v19 }
 0x219   : > { %2304 = vst [vmem:[#allocation16_spill] sm:$0xff] %v2072_v47  ;;  %2305 = vst [vmem:[#allocation17_spill] sm:$0xff] %v2074_v33  ;;  %v906_v20 = vpop.f32.mrf.mxu0  ;;  %v1019_v48 = vpop.f32.mrf.mxu1 }
 0x21a   : > { %2306 = vst [vmem:[#allocation18_spill] sm:$0xff] %v2097_v34  ;;  %2307 = vst [vmem:[#allocation19_spill] sm:$0xff] %v2100_v43  ;;  %v2103_v46 = vadd.f32 %v906_v20, %v2050_v60  ;;  %v2106_v25 = vadd.f32 %v1019_v48, %v2050_v60 }
 0x21b   : > { %v2076_v21 = vpop.f32.mrf.mxu0  ;;  %v2078_v50 = vpop.f32.mrf.mxu1 }
 0x21c   : > { %2308 = vst [vmem:[#allocation20_spill] sm:$0xff] %v2103_v46  ;;  %2309 = vst [vmem:[#allocation21_spill] sm:$0xff] %v2106_v25 }
 0x21d   : > { %v912_v22 = vpop.f32.mrf.mxu0  ;;  %v1025_v51 = vpop.f32.mrf.mxu1 }
 0x21e   : > { %v2109_v4 = vadd.f32 %v912_v22, %v2044_v59  ;;  %v2112_v3 = vadd.f32 %v1025_v51, %v2044_v59 }
 0x21f   : > { %v2080_v11 = vpop.f32.mrf.mxu0  ;;  %v2082_v12 = vpop.f32.mrf.mxu1 }
 0x220   : > { %2310 = vst [vmem:[#allocation22_spill] sm:$0xff] %v2109_v4  ;;  %2311 = vst [vmem:[#allocation23_spill] sm:$0xff] %v2112_v3 }
 0x221   : > { %v916_v15 = vpop.f32.mrf.mxu0  ;;  %v1029_v16 = vpop.f32.mrf.mxu1 }
 0x222   : > { %v2115_v26 = vadd.f32 %v916_v15, %v2046_v41  ;;  %v2118_v27 = vadd.f32 %v1029_v16, %v2046_v41 }
 0x223   : > { %v2084_v7 = vpop.f32.mrf.mxu0  ;;  %v2086_v52 = vpop.f32.mrf.mxu1 }
 0x225   : > { %v922_v8 = vpop.f32.mrf.mxu0  ;;  %v1035_v1 = vpop.f32.mrf.mxu1 }
 0x226   : > { %v2121_v20 = vadd.f32 %v922_v8, %v2040_v55  ;;  %v2124_v48 = vadd.f32 %v1035_v1, %v2040_v55 }
 0x227   : > { %v2088_v9 = vpop.f32.mrf.mxu0  ;;  %v2090_v18 = vpop.f32.mrf.mxu1 }
 0x229   : > { %v926_v10 = vpop.f32.mrf.mxu0  ;;  %v1039_v62 = vpop.f32.mrf.mxu1 }
 0x22a   : > { %v2127_v61 = vadd.f32 %v926_v10, %v2042_v58  ;;  %v2130_v22 = vadd.f32 %v1039_v62, %v2042_v58 }
 0x22b   : > { %v2092_v63 = vpop.f32.mrf.mxu0  ;;  %v2094_v23 = vpop.f32.mrf.mxu1 }
 0x22d   : > { %v932_v24 = vpop.f32.mrf.mxu0  ;;  %v1045_v29 = vpop.f32.mrf.mxu1 }
 0x22e   : > { %v2133_v15 = vadd.f32 %v932_v24, %v2036_v38  ;;  %v2136_v16 = vadd.f32 %v1045_v29, %v2036_v38 }
 0x22f   : > { %v934_v30 = vpop.f32.mrf.mxu0  ;;  %v1047_v39 = vpop.f32.mrf.mxu1 }
 0x230   : > { %v2139_v8 = vadd.f32 %v934_v30, %v2038_v54  ;;  %v2142_v1 = vadd.f32 %v1047_v39, %v2038_v54 }
 0x231   : > { %v936_v40 = vpop.f32.mrf.mxu0  ;;  %v1049_v53 = vpop.f32.mrf.mxu1 }
 0x232   : > { %v2145_v10 = vadd.f32 %v936_v40, %v2038_v54  ;;  %v2148_v62 = vadd.f32 %v1049_v53, %v2038_v54 }
 0x233   : > { %v940_v56 = vpop.f32.mrf.mxu0  ;;  %v1053_v6 = vpop.f32.mrf.mxu1 }
 0x235   : > { %v942_v13 = vpop.f32.mrf.mxu0  ;;  %v1055_v2 = vpop.f32.mrf.mxu1 }
 0x236   : > { %v943_v40 = vadd.f32 %v942_v13, %v2030_v32  ;;  %v1056_v44 = vadd.f32 %v1055_v2, %v2030_v32 }
 0x237   : > { %v944_v5 = vpop.f32.mrf.mxu0  ;;  %v1057_v57 = vpop.f32.mrf.mxu1 }
 0x238   : > { %v945_v35 = vadd.f32 %v944_v5, %v2034_v37  ;;  %v1121_v33 = vmax.f32 %v943_v40, 0.0  ;;  %v1103_v40 = vmax.f32 %v2118_v27, 0.0 }
 0x239   : > { %v946_v49 = vpop.f32.mrf.mxu0  ;;  %v1059_v0 = vpop.f32.mrf.mxu1 }
 0x23a   : > { %v947_v19 = vadd.f32 %v946_v49, %v2034_v37  ;;  %v1060_v24 = vadd.f32 %v1059_v0, %v2034_v37  ;;  %v1124_v47 = vmax.f32 %v945_v35, 0.0  ;;  %v1038_v35 = vadd.f32 %v2090_v18, %v2042_v58 }
 0x23b   : > { %v950_v17 = vpop.f32.mrf.mxu0  ;;  %v1063_v14 = vpop.f32.mrf.mxu1  ;;  %v1034_v18 = vadd.f32 %v2086_v52, %v2040_v55  ;;  %v1101_v52 = vmax.f32 %v2115_v26, 0.0 }
 0x23c   : > { %v951_v54 = vadd.f32 %v950_v17, %v2028_v31  ;;  %v1064_v53 = vadd.f32 %v1063_v14, %v2028_v31  ;;  %v1125_v42 = vmax.f32 %v947_v19, 0.0  ;;  %v1054_v14 = vadd.f32 %v1053_v6, %v2030_v32 }
 0x23d   : > { %v952_v51 = vpop.f32.mrf.mxu0  ;;  %v1065_v36 = vpop.f32.mrf.mxu1 }
 0x23e   : > { %v953_v29 = vadd.f32 %v952_v51, %v2028_v31  ;;  %v1066_v30 = vadd.f32 %v1065_v36, %v2028_v31  ;;  %v1058_v51 = vadd.f32 %v1057_v57, %v2034_v37  ;;  %v941_v31 = vadd.f32 %v940_v56, %v2030_v32 }
 0x23f   : > { %v954_v28 = vpop.f32.mrf.mxu0  ;;  %v1067_v43 = vpop.f32.mrf.mxu1  ;;  %v1128_v4 = vmax.f32 %v951_v54, 0.0  ;;  %v1130_v5 = vmax.f32 %v1064_v53, 0.0  ;;  %v1123_v37 = vmax.f32 %v1056_v44, 0.0  ;;  %v931_v32 = vadd.f32 %v2092_v63, %v2036_v38 }
 0x240   : > { %v955_v34 = vadd.f32 %v954_v28, %v2032_v45  ;;  %v1068_v39 = vadd.f32 %v1067_v43, %v2032_v45  ;;  %v1127_v43 = vmax.f32 %v1060_v24, 0.0  ;;  %v1129_v46 = vmax.f32 %v953_v29, 0.0 }
 0x241   : > { %v956_v49 = vpop.f32.mrf.mxu0  ;;  %v1069_v0 = vpop.f32.mrf.mxu1  ;;  %v1131_v2 = vmax.f32 %v1066_v30, 0.0  ;;  %v1119_v29 = vmax.f32 %v2148_v62, 0.0  ;;  %v1162_v30 = vpack.c.bf16 %v1125_v42, %v1121_v33  ;;  %v1044_v44 = vadd.f32 %v2094_v23, %v2036_v38 }
 0x242   : > { %v957_v36 = vadd.f32 %v956_v49, %v2032_v45  ;;  %v1070_v28 = vadd.f32 %v1069_v0, %v2032_v45  ;;  %v1132_v25 = vmax.f32 %v955_v34, 0.0  ;;  %v1134_v13 = vmax.f32 %v1068_v39, 0.0 }
 0x243   : > { %v1126_v45 = vmax.f32 %v1058_v51, 0.0  ;;  %v1117_v34 = vmax.f32 %v2145_v10, 0.0  ;;  %v1164_v39 = vpack.c.bf16 %v1127_v43, %v1123_v37  ;;  %v1122_v56 = vmax.f32 %v1054_v14, 0.0  ;;  %v2313_v51 = vld [vmem:[#allocation17_spill] sm:$0xff] }
 0x244   : > { %v1133_v3 = vmax.f32 %v957_v36, 0.0  ;;  %v1135_v17 = vmax.f32 %v1070_v28, 0.0  ;;  %v1165_v19 = vpack.c.bf16 %v1132_v25, %v1128_v4  ;;  %v1167_v24 = vpack.c.bf16 %v1134_v13, %v1130_v5  ;;  %v2314_v36 = vld [vmem:[#allocation22_spill] sm:$0xff]  ;;  %v2315_v28 = vld [vmem:[#allocation23_spill] sm:$0xff] }
 0x245   : > { %v925_v4 = vadd.f32 %v2088_v9, %v2042_v58  ;;  %v1113_v42 = vmax.f32 %v2133_v15, 0.0  ;;  %v1115_v33 = vmax.f32 %v2136_v16, 0.0  ;;  %v1116_v63 = vmax.f32 %v2139_v8, 0.0 }
 0x246   : > { %v1166_v57 = vpack.c.bf16 %v1133_v3, %v1129_v46  ;;  %v1168_v49 = vpack.c.bf16 %v1135_v17, %v1131_v2  ;;  %v1120_v3 = vmax.f32 %v941_v31, 0.0  ;;  %v1118_v38 = vmax.f32 %v2142_v1, 0.0  ;;  %v2317_v31 = vld [vmem:[#allocation21_spill] sm:$0xff] }
 0x247   : > { %v1163_v6 = vpack.c.bf16 %v1126_v45, %v1122_v56  ;;  %v1109_v46 = vmax.f32 %v2127_v61, 0.0  ;;  %v1111_v25 = vmax.f32 %v2130_v22, 0.0  ;;  %v1158_v9 = vpack.c.bf16 %v1117_v34, %v1113_v42 }
 0x248   : > { %1175 = vmatprep.subr.bf16.mxu0 %v1166_v57  ;;  %1216 = vmatprep.subr.bf16.mxu1 %v1168_v49  ;;  %v1161_v23 = vpack.c.bf16 %v1124_v47, %v1120_v3  ;;  %v1160_v10 = vpack.c.bf16 %v1119_v29, %v1115_v33  ;;  %v921_v58 = vadd.f32 %v2084_v7, %v2040_v55  ;;  %v1112_v15 = vmax.f32 %v931_v32, 0.0  ;;  %v2318_v57 = vld [vmem:[#allocation11_spill] sm:$0xff]  ;;  %v2319_v49 = vld [vmem:[#allocation10_spill] sm:$0xff] }
 0x249   : > { %1176 = vmatpush1.bf16.msra.mxu0 %v1165_v19  ;;  %1217 = vmatpush1.bf16.msra.mxu1 %v1167_v24  ;;  %v1114_v16 = vmax.f32 %v1044_v44, 0.0  ;;  %v915_v47 = vadd.f32 %v2080_v11, %v2046_v41  ;;  %v1028_v61 = vadd.f32 %v2082_v12, %v2046_v41  ;;  %v1105_v22 = vmax.f32 %v2121_v20, 0.0  ;;  %v2321_v29 = vld [vmem:[#allocation18_spill] sm:$0xff] }
 0x24a   : > { %1177 = vmatprep.subr.bf16.mxu0 %v1162_v30  ;;  %1218 = vmatprep.subr.bf16.mxu1 %v1164_v39  ;;  %v1107_v8 = vmax.f32 %v2124_v48, 0.0  ;;  %v1108_v7 = vmax.f32 %v925_v4, 0.0  ;;  %v1110_v1 = vmax.f32 %v1038_v35, 0.0  ;;  %v1157_v62 = vpack.c.bf16 %v1116_v63, %v1112_v15  ;;  %v2312_v48 = vld [vmem:[#allocation16_spill] sm:$0xff]  ;;  %v2322_v39 = vld [vmem:[#allocation19_spill] sm:$0xff]  ;;  %v2330_v15 = vld [vmem:[#allocation13_spill] sm:$0xff] }
 0x24b   : > { %v1159_v55 = vpack.c.bf16 %v1118_v38, %v1114_v16  ;;  %v1154_v54 = vpack.c.bf16 %v1109_v46, %v1105_v22  ;;  %v911_v11 = vadd.f32 %v2076_v21, %v2044_v59  ;;  %v1024_v41 = vadd.f32 %v2078_v50, %v2044_v59  ;;  %v2316_v50 = vld [vmem:[#allocation20_spill] sm:$0xff]  ;;  %v2324_v46 = vld [vmem:[#allocation15_spill] sm:$0xff] }
 0x24c   : > { %v1156_v53 = vpack.c.bf16 %v1111_v25, %v1107_v8  ;;  %v1104_v12 = vmax.f32 %v921_v58, 0.0  ;;  %v1106_v20 = vmax.f32 %v1034_v18, 0.0  ;;  %v905_v0 = vadd.f32 %v2312_v48, %v2050_v60  ;;  %v2325_v25 = vld [vmem:[#allocation8_spill] sm:$0xff]  ;;  %v2328_v58 = vld [vmem:[#allocation9_spill] sm:$0xff]  ;;  %v1136_v16 = vld [vmem:[%s2263_s4] sm:$0xf] }
 0x24d   : > { %1178 = vmatpush1.bf16.msra.mxu0 %v1161_v23  ;;  %1219 = vmatpush1.bf16.msra.mxu1 %v1163_v6  ;;  %v1018_v26 = vadd.f32 %v2313_v51, %v2050_v60  ;;  %v1097_v27 = vmax.f32 %v2314_v36, 0.0  ;;  %v1099_v43 = vmax.f32 %v2315_v28, 0.0  ;;  %v1100_v21 = vmax.f32 %v915_v47, 0.0  ;;  %v2320_v60 = vld [vmem:[#allocation7_spill] sm:$0xff]  ;;  %v2323_v6 = vld [vmem:[#allocation6_spill] sm:$0xff]  ;;  %v2329_v18 = vld [vmem:[#allocation12_spill] sm:$0xff]  ;;  %v1173_v47 = vpop.permute.xlu0 %1172 }
 0x24e   : > { %1179 = vmatprep.subr.bf16.mxu0 %v1158_v9  ;;  %1220 = vmatprep.subr.bf16.mxu1 %v1160_v10  ;;  %v1102_v13 = vmax.f32 %v1028_v61, 0.0  ;;  %v1153_v2 = vpack.c.bf16 %v1108_v7, %v1104_v12  ;;  %v1155_v59 = vpack.c.bf16 %v1110_v1, %v1106_v20  ;;  %v1093_v17 = vmax.f32 %v2316_v50, 0.0  ;;  %v2326_v9 = vld [vmem:[#allocation5_spill] sm:$0xff]  ;;  %v2327_v10 = vld [vmem:[#allocation14_spill] sm:$0xff] }
 0x24f   : > { %v1095_v14 = vmax.f32 %v2317_v31, 0.0  ;;  %v1150_v5 = vpack.c.bf16 %v1101_v52, %v1097_v27  ;;  %v1152_v37 = vpack.c.bf16 %v1103_v40, %v1099_v43  ;;  %v901_v45 = vadd.f32 %v2319_v49, %v2318_v57 }
 0x250   : > { %v1014_v19 = vadd.f32 %v2320_v60, %v2318_v57  ;;  %v1096_v24 = vmax.f32 %v911_v11, 0.0  ;;  %v1098_v34 = vmax.f32 %v1024_v41, 0.0  ;;  %v1089_v30 = vmax.f32 %v2321_v29, 0.0 }
 0x251   : > { %1180 = vmatpush1.bf16.msra.mxu0 %v1157_v62  ;;  %1221 = vmatpush1.bf16.msra.mxu1 %v1159_v55  ;;  %v1091_v32 = vmax.f32 %v2322_v39, 0.0  ;;  %v1092_v44 = vmax.f32 %v905_v0, 0.0  ;;  %v1094_v3 = vmax.f32 %v1018_v26, 0.0  ;;  %v1088_v33 = vmax.f32 %v901_v45, 0.0 }
 0x252   : > { %1181 = vmatprep.subr.bf16.mxu0 %v1154_v54  ;;  %1222 = vmatprep.subr.bf16.mxu1 %v1156_v53  ;;  %v1149_v56 = vpack.c.bf16 %v1100_v21, %v1096_v24  ;;  %v1151_v4 = vpack.c.bf16 %v1102_v13, %v1098_v34  ;;  %v1146_v35 = vpack.c.bf16 %v1093_v17, %v1089_v30  ;;  %v1090_v63 = vmax.f32 %v1014_v19, 0.0 }
 0x253   : > { %v1148_v42 = vpack.c.bf16 %v1095_v14, %v1091_v32  ;;  %v1145_v38 = vpack.c.bf16 %v1092_v44, %v1088_v33  ;;  %v1605_v44 = vld [vmem:[%s1763_s13] sm:$0xff] }
 0x254   : > { %v1147_v23 = vpack.c.bf16 %v1094_v3, %v1090_v63  ;;  %v256_v3 = vunpack.c.l.bf16 %v1605_v44  ;;  %v257_v63 = vunpack.c.h.bf16 %v1605_v44 }
 0x255   : > { %1182 = vmatpush1.bf16.msra.mxu0 %v1153_v2  ;;  %1223 = vmatpush1.bf16.msra.mxu1 %v1155_v59 }
 0x256   : > { %1183 = vmatprep.subr.bf16.mxu0 %v1150_v5  ;;  %1224 = vmatprep.subr.bf16.mxu1 %v1152_v37  ;;  %vm1301_vm2 = vcmp.gt.f32.partialorder %v256_v3, 0.5  ;;  %vm1302_vm4 = vcmp.gt.f32.partialorder %v257_v63, 0.5 }
 0x259   : > { %1184 = vmatpush1.bf16.msra.mxu0 %v1149_v56  ;;  %1225 = vmatpush1.bf16.msra.mxu1 %v1151_v4  ;;  %v1670_v56 = vmov 1966171168  }
 0x25a   : > { %1185 = vmatprep.subr.bf16.mxu0 %v1146_v35  ;;  %1226 = vmatprep.subr.bf16.mxu1 %v1148_v42  ;;  %v1332_v4 = vunpack.c.l.s4 %v1670_v56  ;;  %v1334_v35 = vlaneseq  ;;  %v1606_v42 = vld [vmem:[%s1763_s13 + $0x8] sm:$0xff]  ;;  %s243_s13 = sand.u32 1, %s1659_s22  }
 0x25b   : > { %v258_v33 = vunpack.c.l.bf16 %v1606_v42  ;;  %s1470_s11 = sshll.u32 %s243_s13, 3  ;;  %s1393_s19 = scalar_lea.sflag [#allocation3], %s243_s13 }
 0x25c   : > { %vm1357_vm6 = vcmp.lt.s32.totalorder %v1334_v35, 512  ;;  %s245_s14 = scalar_lea.vmem [#allocation2], %s1470_s11 }
 0x25d   : > { %1186 = vmatpush1.bf16.msra.mxu0 %v1145_v38  ;;  %1227 = vmatpush1.bf16.msra.mxu1 %v1147_v23  ;;  %v259_v38 = vunpack.c.h.bf16 %v1606_v42  ;;  %vm1303_vm3 = vcmp.gt.f32.partialorder %v258_v33, 0.5  ;;  %s1407_s15 = sshll.u32 %s245_s14, 4  ;;  %s1408_s15 = int_to_ptr.vmem [resolvable:$true] %s1407_s15 }
 0x25e   : > { %1187 = vmatprep.subr.bf16.mxu0 %v2323_v6  ;;  %1228 = vmatprep.subr.bf16.mxu1 %v2324_v46  ;;  %v1333_v6 = vunpack.c.0.s8 %v1332_v4  ;;  %v1335_v46 = vshrl.u32 %v1334_v35, 7  ;;  %s1607_s20 = scalar_lea.vmem %s1408_s15, 128  ;;  %p1614_p0 = scmp.lt.s32.totalorder %s1408_s15, %s1612_s25 }
 0x25f   : > { %vm1304_vm5 = vcmp.gt.f32.partialorder %v259_v38, 0.5  ;;  %p1608_p11 = scmp.ne.s32.totalorder %s1408_s15, %s1607_s20  ;;  %p1615_p1 = scmp.lt.s32.totalorder %s1613_s28, %s1607_s20 }
 0x261   : > { %1188 = vmatpush1.bf16.msra.mxu0 %v2325_v25  ;;  %1229 = vmatpush1.bf16.msra.mxu1 %v2326_v9  ;;  %p1609_p12 = pnand %p1608_p11, %p1745_p5  ;;  %p1616_p2 = por %p1615_p1, %p1614_p0 }
 0x262   : > { %1189 = vmatprep.subr.bf16.mxu0 %v2327_v10  ;;  %1230 = vmatprep.subr.bf16.mxu1 %v2328_v58 }
 0x263   : > { %p1610_p13 = pneg %p1609_p12 }
 0x265   : > { %1190 = vmatpush1.bf16.msra.mxu0 %v2329_v18  ;;  %1231 = vmatpush1.bf16.msra.mxu1 %v2330_v15  ;;  %p1617_p3 = pnand %p1616_p2, %p1610_p13 }
 0x268   : > { %1208 = vmatmul.mubr.bf16.vlgmr.msra.gmra.mxu0 %v1136_v16  ;;  %1249 = vmatmul.mubr.bf16.vlgmr.msra.gmra.mxu1 %v1136_v16 }
 0x328   : > { %v1209_v61 = vpop.f32.mrf.mxu0  ;;  %v1250_v22 = vpop.f32.mrf.mxu1 }
 0x329   : > { %v1210_v8 = vadd.f32 %v1209_v61, %v1173_v47  ;;  %v1251_v7 = vadd.f32 %v1250_v22, %v1173_v47  ;;  %v1336_v22 = vsub.s32 %v1333_v6, %v1335_v46 }
 0x32a   : > { %v1211_v1 = vpop.f32.mrf.mxu0  ;;  %v1252_v62 = vpop.f32.mrf.mxu1 }
 0x32b   : > { %1581 = vtanh.f32 %v1210_v8  ;;  %v1212_v55 = vadd.f32 %v1211_v1, %v1173_v47  ;;  %v1253_v52 = vadd.f32 %v1252_v62, %v1173_v47 }
 0x32c   : > { %1583 = vtanh.f32 %v1251_v7  ;;  %v1213_v40 = vpop.f32.mrf.mxu0  ;;  %v1254_v54 = vpop.f32.mrf.mxu1 }
 0x32d   : > { %1585 = vtanh.f32 %v1212_v55 }
 0x32e   : > { %1587 = vtanh.f32 %v1253_v52  ;;  %v1214_v53 = vpop.f32.mrf.mxu0  ;;  %v1255_v11 = vpop.f32.mrf.mxu1 }
 0x338   : > { %v1582_v41 = vpop.eup %1581 }
 0x339   : > { %v1584_v12 = vpop.eup %1583  ;;  %v1261_v20 = vmul.f32 10.0, %v1582_v41 }
 0x33a   : > { %v1586_v48 = vpop.eup %1585  ;;  %v1263_v0 = vmul.f32 10.0, %v1584_v12 }
 0x33b   : > { %v1588_v51 = vpop.eup %1587  ;;  %v1269_v26 = vrot.slane %v1261_v20, 7  ;;  %v1262_v36 = vmul.f32 10.0, %v1586_v48 }
 0x33c   : > { %v1271_v27 = vrot.slane %v1263_v0, 7  ;;  %v1264_v28 = vmul.f32 10.0, %v1588_v51 }
 0x33d   : > { %v1277_v43 = vsub.f32 %v1261_v20, %v1269_v26  ;;  %v1270_v21 = vrot.slane %v1262_v36, 7 }
 0x33e   : > { %v1279_v13 = vsub.f32 %v1263_v0, %v1271_v27  ;;  %v1272_v2 = vrot.slane %v1264_v28, 7 }
 0x33f   : > { %v1281_v59 = vsub.f32 0.0, %v1277_v43  ;;  %v1278_v50 = vsub.f32 %v1262_v36, %v1270_v21 }
 0x340   : > { %v1283_v17 = vsub.f32 0.0, %v1279_v13  ;;  %v1280_v31 = vsub.f32 %v1264_v28, %v1272_v2 }
 0x341   : > { %v1285_v14 = vmul.f32 1.442695, %v1281_v59  ;;  %v1282_v5 = vsub.f32 0.0, %v1278_v50 }
 0x342   : > { %v1289_v37 = vmul.f32 1.442695, %v1283_v17  ;;  %v1284_v57 = vsub.f32 0.0, %v1280_v31 }
 0x343   : > { %1589 = vpow2.f32 %v1285_v14  ;;  %v1287_v49 = vmul.f32 1.442695, %v1282_v5 }
 0x344   : > { %1591 = vpow2.f32 %v1289_v37  ;;  %v1291_v45 = vmul.f32 1.442695, %v1284_v57 }
 0x345   : > { %1593 = vpow2.f32 %v1287_v49 }
 0x346   : > { %1595 = vpow2.f32 %v1291_v45 }
 0x350   : > { %v1590_v60 = vpop.eup %1589 }
 0x351   : > { %v1592_v19 = vpop.eup %1591  ;;  %v1293_v24 = vadd.f32 1.0, %v1590_v60 }
 0x352   : > { %v1594_v34 = vpop.eup %1593  ;;  %v1295_v29 = vadd.f32 1.0, %v1592_v19 }
 0x353   : > { %v1596_v30 = vpop.eup %1595  ;;  %1597 = vrcp.f32 %v1293_v24  ;;  %v1294_v39 = vadd.f32 1.0, %v1594_v34 }
 0x354   : > { %1599 = vrcp.f32 %v1295_v29  ;;  %v1296_v32 = vadd.f32 1.0, %v1596_v30 }
 0x355   : > { %1601 = vrcp.f32 %v1294_v39 }
 0x356   : > { %1603 = vrcp.f32 %v1296_v32 }
 0x360   : > { %v1598_v23 = vpop.eup %1597 }
 0x361   : > { %v1600_v25 = vpop.eup %1599  ;;  %v1309_v9 = vrot.slane %v1598_v23, 3 }
 0x362   : > { %v1602_v10 = vpop.eup %1601  ;;  %v1311_v58 = vrot.slane %v1600_v25, 3 }
 0x363   : > { %v1604_v18 = vpop.eup %1603  ;;  %v1317_v15 = vsel %vm1301_vm2, 1.0, %v1309_v9  ;;  %v1310_v16 = vrot.slane %v1602_v10, 3 }
 0x364   : > { %v1319_v47 = vsel %vm1303_vm3, 1.0, %v1311_v58  ;;  %v1312_v61 = vrot.slane %v1604_v18, 3  ;;  %v1321_v7 = vsub.f32 1.0, %v1317_v15 }
 0x365   : > { %v1318_v8 = vsel %vm1302_vm4, 1.0, %v1310_v16  ;;  %v1323_v52 = vsub.f32 1.0, %v1319_v47 }
 0x366   : > { %v1322_v1 = vsub.f32 1.0, %v1318_v8  ;;  %v1320_v62 = vsel %vm1304_vm5, 1.0, %v1312_v61  ;;  %v1364_v55 = vcombine.high %v1317_v15, %v1318_v8 }
 0x367   : > { %v1324_v40 = vsub.f32 1.0, %v1320_v62  ;;  %v1365_v54 = vcombine.high %v1319_v47, %v1320_v62 }
 0x368   : > { %v1329_v53 = vcombine.high %v1321_v7, %v1322_v1  ;;  %v1372_v11 = vrot.slane %v1364_v55, %v1336_v22 }
 0x369   : > { %v1330_v41 = vcombine.high %v1323_v52, %v1324_v40  ;;  %v1379_v12 = vrot.slane %v1365_v54, %v1336_v22 }
 0x36a   : > { %v1337_v20 = vrot.slane %v1329_v53, %v1336_v22 }
 0x36b   : > { %v1344_v48 = vrot.slane %v1330_v41, %v1336_v22  ;;  %v1380_v0 = vcombine.low %v1372_v11, %v1379_v12 }
 0x36d   : > { %v1345_v51 = vcombine.low %v1337_v20, %v1344_v48  ;;  %v1387_v26 = vrot.slane %v1380_v0, %v1336_v22 }
 0x36f   : > { %v1352_v36 = vrot.slane %v1345_v51, %v1336_v22  ;;  %v1388_v27 = vcombine.high %v1387_v26, %v1387_v26 }
 0x371   : > { %v1353_v28 = vcombine.high %v1352_v36, %v1352_v36  ;;  %1511 = vst.msk [vmem:[%s245_s14 + $0x1] ss:$2 sm:$0xf] %vm1357_vm6, %v1388_v27 }
 0x373   : > { %1359 = vst.msk [vmem:[%s245_s14] ss:$2 sm:$0xf] %vm1357_vm6, %v1353_v28 }
 0x374   : > { %1620 = shalt.err (!%p1617_p3)
}
 0x375   : > { %s1621_s29 = scalar_lea.hbm %s1405_s18, 128  ;;  %s1625_s13 = scalar_lea.hbm %s2265_s6, 256 }
 0x376   : > { %p1622_p4 = scmp.ne.s32.totalorder %s1405_s18, %s1621_s29  ;;  %p1626_p9 = scmp.lt.s32.totalorder %s1405_s18, %s2265_s6 }
 0x377   : > { %p1627_p10 = scmp.lt.s32.totalorder %s1625_s13, %s1621_s29 }
 0x378   : > { %p1623_p7 = pnand %p1622_p4, %p1745_p5 }
 0x379   : > { %p1628_p11 = por %p1627_p10, %p1626_p9 }
 0x37a   : > { %p1624_p8 = pneg %p1623_p7 }
 0x37c   : > { %p1629_p12 = pnand %p1628_p11, %p1624_p8 }
 0x37e   : > { %1632 = shalt.err (!%p1629_p12)
}
 0x37f   : > { %1518 = dma.vmem_to_hbm [thread:$0]  (%p1745_p5), %s1408_s15, 128, %s1405_s18, %s1393_s19  }
 0x380 PF: > { %p1524_p13 = scmp.ge.s32.totalorder %s1667_s24, 2  ;;  %s1419_s14 = sand.u32 1, %s1655_s21  }
 0x381   : > { %s1420_s16 = scalar_lea.sflag [#allocation3], %s1419_s14 }
 0x382   : > { %p1521_p0 = pnand %p1524_p13, %p1749_p6 }
 0x384   : > { %p1522_p1 = pneg %p1521_p0 }
 0x386   : > { %1650 = dma.done.wait (%p1522_p1), %s1420_s16, 128  }
 0x387   : > { %1652 = vsyncadd (%p1522_p1), %s1420_s16, 4294967168  ;;  %p16_p2 = scmp.ge.s32.totalorder %s1732_s27, 4   ;;  %s2331_s21 = smov %s1659_s22 }
 0x388   : > { %s2332_s22 = smov %s1663_s23  ;;  %s2333_s23 = smov %s1743_s30 }
 0x389   : > { %s2334_s24 = smov %s1732_s27  ;;  %18 = sbr.rel (!%p16_p2) target bundleno = 3 (0x3), region = 80 }
 0x38e   :  { %1425 = vsyncpa [#allocation3], 1 }
 0x38f   :  { %1427 = vsyncpa [#allocation3 + $0x1], 1 }

</bundles_post_ra>
